<compile_context>
chip_gen: v7x
topology: tpu7x:2x2x1
jax: 0.10.0
libtpu: 0.0.40
codegen_flags: <defaults>
</compile_context>

<pallas_src>
import functools

import jax
import jax.numpy as jnp
from jax.experimental import pallas as pl
from jax.experimental.pallas import tpu as pltpu

SUBLANE = 8  # vreg sublane width: batch tiles are rounded to this


def _round_up(n, m):
    return ((n + m - 1) // m) * m


def qnet_kernel(x_ref, w1_ref, b1_ref, w2_ref, b2_ref, out_ref):
    # fc1 + ReLU  (MXU matmul with f32 accumulation, VPU bias+ReLU)
    x = x_ref[...]
    if x.dtype != w1_ref.dtype:
        x = x.astype(w1_ref.dtype)
    h = jnp.dot(x, w1_ref[...], preferred_element_type=jnp.float32)
    h = jnp.maximum(h + b1_ref[...], 0.0)          # b1 is (1, H) -> broadcasts
    # fc2
    if h.dtype != w2_ref.dtype:
        h = h.astype(w2_ref.dtype)
    y = jnp.dot(h, w2_ref[...], preferred_element_type=jnp.float32)
    out_ref[...] = (y + b2_ref[...]).astype(out_ref.dtype)


@functools.partial(jax.jit, static_argnames=("block_b",))
def qnet_forward(x, w1, b1, w2, b2, *, block_b=2048):
    """x: (B, state_dim); returns (B, action_dim) float32.

    w1: (state_dim, hidden_dim), w2: (hidden_dim, action_dim),
    b1: (1, hidden_dim) f32, b2: (1, action_dim) f32 — as produced by
    init_qnet_params.  No feature-dim padding is done: block shapes equal the
    full feature extents.  Only the batch axis is padded up to a multiple of
    the batch tile (8-sublane aligned).
    """
    B, state_dim = x.shape
    hidden_dim = w1.shape[1]
    action_dim = w2.shape[1]

    # Batch tiling only: one grid step for typical batches, TB divides Bp.
    B8 = _round_up(B, SUBLANE)
    TB = min(_round_up(block_b, SUBLANE), B8)
    Bp = _round_up(B8, TB)

    if Bp != B:
        x = jnp.pad(x, ((0, Bp - B), (0, 0)))

    grid = (Bp // TB,)

    out_p = pl.pallas_call(
        qnet_kernel,
        out_shape=jax.ShapeDtypeStruct((Bp, action_dim), jnp.float32),
        grid_spec=pltpu.PrefetchScalarGridSpec(
            num_scalar_prefetch=0,
            grid=grid,
            in_specs=[
                # x: streamed per batch tile, feature dim unpadded (== full dim).
                pl.BlockSpec((TB, state_dim), lambda i: (i, 0)),
                # Parameters: full-array blocks, constant index_map -> VMEM-resident.
                pl.BlockSpec((state_dim, hidden_dim), lambda i: (0, 0)),
                pl.BlockSpec((1, hidden_dim), lambda i: (0, 0)),
                pl.BlockSpec((hidden_dim, action_dim), lambda i: (0, 0)),
                pl.BlockSpec((1, action_dim), lambda i: (0, 0)),
            ],
            out_specs=pl.BlockSpec((TB, action_dim), lambda i: (i, 0)),
        ),
        compiler_params=pltpu.CompilerParams(
            dimension_semantics=("parallel",),  # shard batch tiles across TCs (v7x)
        ),
    )(x, w1, b1, w2, b2)

    if Bp != B:
        out_p = out_p[:B]
    return out_p


def init_qnet_params(key, state_dim, hidden_dim, action_dim,
                     param_dtype=jnp.float32):
    """Deterministic init mimicking nn.Linear's uniform(-1/sqrt(in), 1/sqrt(in)).

    Weights stored (in, out); biases stored (1, out) in f32 — everything is
    already in the exact layout the kernel consumes, so the per-call forward
    does no parameter reshaping/padding.  Use param_dtype=jnp.bfloat16 on
    v6e/v7x to halve weight DMA bytes (f32 accumulation is kept in-kernel;
    loosen comparison tolerances if you enable it).
    """
    k1, k2, k3, k4 = jax.random.split(key, 4)
    bound1 = 1.0 / jnp.sqrt(state_dim)
    bound2 = 1.0 / jnp.sqrt(hidden_dim)
    w1 = jax.random.uniform(k1, (state_dim, hidden_dim), jnp.float32,
                            -bound1, bound1).astype(param_dtype)
    b1 = jax.random.uniform(k2, (1, hidden_dim), jnp.float32, -bound1, bound1)
    w2 = jax.random.uniform(k3, (hidden_dim, action_dim), jnp.float32,
                            -bound2, bound2).astype(param_dtype)
    b2 = jax.random.uniform(k4, (1, action_dim), jnp.float32, -bound2, bound2)
    return w1, b1, w2, b2


def _reference(x, w1, b1, w2, b2):
    h = jnp.maximum(x @ w1.astype(jnp.float32) + b1, 0.0)
    return h @ w2.astype(jnp.float32) + b2


if __name__ == "__main__":
    # Small DQN-style shapes: CartPole-like state_dim=4, action_dim=2.
    batch, state_dim, hidden_dim, action_dim = 2, 4, 32, 2

    key = jax.random.PRNGKey(0)
    k_params, k_x, k_big = jax.random.split(key, 3)
    w1, b1, w2, b2 = init_qnet_params(k_params, state_dim, hidden_dim, action_dim)
    x = jax.random.normal(k_x, (batch, state_dim), jnp.float32)

    out = qnet_forward(x, w1, b1, w2, b2)
    jax.block_until_ready(out)
    ref = _reference(x, w1, b1, w2, b2)
    assert out.shape == (batch, action_dim)
    assert jnp.allclose(out, ref, atol=1e-5, rtol=1e-5)

    # Replay-minibatch sized batch: single grid step (TB = 1024 <= block_b),
    # VMEM-resident weights, unpadded feature dims.
    x_big = jax.random.normal(k_big, (1024, state_dim), jnp.float32)
    out_big = qnet_forward(x_big, w1, b1, w2, b2)
    jax.block_until_ready(out_big)
    ref_big = _reference(x_big, w1, b1, w2, b2)
    assert out_big.shape == (1024, action_dim)
    assert jnp.allclose(out_big, ref_big, atol=1e-4, rtol=1e-4)

    # Larger batch that exercises the multi-tile grid path (grid > 1, tiles
    # split across TensorCores on v7x via dimension_semantics=("parallel",)).
    x_huge = jax.random.normal(jax.random.PRNGKey(7), (4096, state_dim), jnp.float32)
    out_huge = qnet_forward(x_huge, w1, b1, w2, b2)
    jax.block_until_ready(out_huge)
    ref_huge = _reference(x_huge, w1, b1, w2, b2)
    assert out_huge.shape == (4096, action_dim)
    assert jnp.allclose(out_huge, ref_huge, atol=1e-4, rtol=1e-4)

    print("KERNEL_OK")
</pallas_src>

<mosaic_0001>
module attributes {stable_mosaic.version = 11 : i64} {
  func.func @qnet_kernel(%arg0: i32, %arg1: memref<8x4xf32, #tpu.memory_space<vmem>>, %arg2: memref<4x32xf32, #tpu.memory_space<vmem>>, %arg3: memref<1x32xf32, #tpu.memory_space<vmem>>, %arg4: memref<32x2xf32, #tpu.memory_space<vmem>>, %arg5: memref<1x2xf32, #tpu.memory_space<vmem>>, %arg6: memref<8x2xf32, #tpu.memory_space<vmem>>) attributes {dimension_semantics = [#tpu.dimension_semantics<parallel>], iteration_bounds = array<i64: 1>, scalar_prefetch = 0 : i64, scratch_operands = 0 : i64, tpu.core_type = #tpu.core_type<tc>, window_params = [{transform_indices = @transform_0, window_bounds = array<i64: 8, 4>}, {pipeline_mode = #tpu.pipeline_mode<synchronous>, transform_indices = @transform_1, window_bounds = array<i64: 4, 32>}, {pipeline_mode = #tpu.pipeline_mode<synchronous>, transform_indices = @transform_2, window_bounds = array<i64: 1, 32>}, {pipeline_mode = #tpu.pipeline_mode<synchronous>, transform_indices = @transform_3, window_bounds = array<i64: 32, 2>}, {pipeline_mode = #tpu.pipeline_mode<synchronous>, transform_indices = @transform_4, window_bounds = array<i64: 1, 2>}, {transform_indices = @transform_5, window_bounds = array<i64: 8, 2>}]} {
    %c0 = arith.constant 0 : index
    %c0_0 = arith.constant 0 : index
    %0 = vector.load %arg1[%c0, %c0_0] : memref<8x4xf32, #tpu.memory_space<vmem>>, vector<8x4xf32>
    %c0_1 = arith.constant 0 : index
    %c0_2 = arith.constant 0 : index
    %1 = vector.load %arg2[%c0_1, %c0_2] : memref<4x32xf32, #tpu.memory_space<vmem>>, vector<4x32xf32>
    %cst = arith.constant dense<0.000000e+00> : vector<8x32xf32>
    %2 = tpu.matmul %0, %1, %cst {dimension_numbers = #tpu.dot_dimension_numbers<[1], [0], [0], [1], [0, 0, 1, 1], [], []>} : vector<8x4xf32>, vector<4x32xf32>, vector<8x32xf32> -> vector<8x32xf32>
    %c0_3 = arith.constant 0 : index
    %c0_4 = arith.constant 0 : index
    %3 = vector.load %arg3[%c0_3, %c0_4] : memref<1x32xf32, #tpu.memory_space<vmem>>, vector<1x32xf32>
    %4 = vector.broadcast %3 : vector<1x32xf32> to vector<8x32xf32>
    %5 = arith.addf %2, %4 : vector<8x32xf32>
    %cst_5 = arith.constant 0.000000e+00 : f32
    %6 = vector.broadcast %cst_5 : f32 to vector<8x32xf32>
    %7 = arith.maximumf %5, %6 : vector<8x32xf32>
    %c0_6 = arith.constant 0 : index
    %c0_7 = arith.constant 0 : index
    %8 = vector.load %arg4[%c0_6, %c0_7] : memref<32x2xf32, #tpu.memory_space<vmem>>, vector<32x2xf32>
    %cst_8 = arith.constant dense<0.000000e+00> : vector<8x2xf32>
    %9 = tpu.matmul %7, %8, %cst_8 {dimension_numbers = #tpu.dot_dimension_numbers<[1], [0], [0], [1], [0, 0, 1, 1], [], []>} : vector<8x32xf32>, vector<32x2xf32>, vector<8x2xf32> -> vector<8x2xf32>
    %c0_9 = arith.constant 0 : index
    %c0_10 = arith.constant 0 : index
    %10 = vector.load %arg5[%c0_9, %c0_10] : memref<1x2xf32, #tpu.memory_space<vmem>>, vector<1x2xf32>
    %11 = vector.broadcast %10 : vector<1x2xf32> to vector<8x2xf32>
    %12 = arith.addf %9, %11 : vector<8x2xf32>
    %c0_11 = arith.constant 0 : index
    %c0_12 = arith.constant 0 : index
    %13 = vector.load %arg6[%c0_11, %c0_12] : memref<8x2xf32, #tpu.memory_space<vmem>>, vector<8x2xf32>
    tpu.vector_store %arg6[%c0_11, %c0_12], %12 {strides = array<i32>} : memref<8x2xf32, #tpu.memory_space<vmem>>, vector<8x2xf32>,
    return
  }
  func.func @transform_0(%arg0: i32) -> (i32, i32) {
    %c0_i32 = arith.constant 0 : i32
    %c0_i32_0 = arith.constant 0 : i32
    return %arg0, %c0_i32 : i32, i32
  }
  func.func @transform_1(%arg0: i32) -> (i32, i32) {
    %c0_i32 = arith.constant 0 : i32
    %c0_i32_0 = arith.constant 0 : i32
    %c0_i32_1 = arith.constant 0 : i32
    return %c0_i32, %c0_i32_0 : i32, i32
  }
  func.func @transform_2(%arg0: i32) -> (i32, i32) {
    %c0_i32 = arith.constant 0 : i32
    %c0_i32_0 = arith.constant 0 : i32
    %c0_i32_1 = arith.constant 0 : i32
    return %c0_i32, %c0_i32_0 : i32, i32
  }
  func.func @transform_3(%arg0: i32) -> (i32, i32) {
    %c0_i32 = arith.constant 0 : i32
    %c0_i32_0 = arith.constant 0 : i32
    %c0_i32_1 = arith.constant 0 : i32
    return %c0_i32, %c0_i32_0 : i32, i32
  }
  func.func @transform_4(%arg0: i32) -> (i32, i32) {
    %c0_i32 = arith.constant 0 : i32
    %c0_i32_0 = arith.constant 0 : i32
    %c0_i32_1 = arith.constant 0 : i32
    return %c0_i32, %c0_i32_0 : i32, i32
  }
  func.func @transform_5(%arg0: i32) -> (i32, i32) {
    %c0_i32 = arith.constant 0 : i32
    %c0_i32_0 = arith.constant 0 : i32
    return %arg0, %c0_i32 : i32, i32
  }
}

</mosaic_0001>

<bundles_post_ra>
// kernel: qnet_forward.1
= control target key start
LH: loop header
LB: loop body
LE: loop exit
PB: predicated region body
PF: predicated region fallthrough
CT: control target
= control target key end

     0   :  { %vm33_vm0 = vcmask 1043456   ;;  %vm29_vm1 = vcmask 31744   ;;  %v236_v0 = vmov 0.0   ;;  %vm237_vm2 = vmmov 0   ;;  %s296_s1 = inlined_call_operand.vmem [shape: f32[4,32], index: 1, kind: input, shape index: {}]   ;;  %s297_s0 = inlined_call_operand.vmem [shape: f32[8,4], index: 0, kind: input, shape index: {}]   ;;  %s298_s3 = inlined_call_operand.vmem [shape: f32[32,2], index: 3, kind: input, shape index: {}]   ;;  %s299_s2 = inlined_call_operand.vmem [shape: f32[1,32], index: 2, kind: input, shape index: {}]   ;;  %s300_s4 = inlined_call_operand.vmem [shape: f32[1,2], index: 4, kind: input, shape index: {}]   ;;  %s301_s5 = inlined_call_operand.vmem [shape: f32[8,2], index: 5, kind: output, shape index: {}]  }
   0x1   :  { %211 = vmatprep.subr.mxu0 %v236_v0  ;;  %v21_v1 = vld [vmem:[%s296_s1] sm:$0xf]  ;;  %213 = vmatprep.mubr.msk.f32.mxu0 %vm237_vm2, %v236_v0  ;;  %v238_v4 = vmov 0.0|0.0   ;;  %v109_v5 = vld [vmem:[%s298_s3 + $0x8] sm:$0xff]  ;;  %v110_v7 = vld [vmem:[%s298_s3 + $0x10] sm:$0xff]  ;;  %vm119_vm3 = vcmask 261120  }
   0x2   :  { %v20_v2 = vld [vmem:[%s297_s0] sm:$0xff]  ;;  %212 = vmatpush3.msk.msra.mxu0 %vm33_vm0, %v21_v1  ;;  %227 = vmatprep.subr.bf16.mxu1 %v238_v4  ;;  %v111_v8 = vld [vmem:[%s298_s3 + $0x18] sm:$0xff]  ;;  %vm193_vm4 = vcmask 15360  }
   0x3   :  { %v108_v3 = vld [vmem:[%s298_s3] sm:$0xff]  ;;  %214 = vmatmul.mubr.msk.f32.vlgmr.msra.gmra.mrb[0].mxu0 %vm29_vm1, %v20_v2  ;;  %224 = vmatprep.mubr.msk.f32.mxu1 %vm237_vm2, %v236_v0  ;;  %v231_v9 = vpack.c.bf16 %v111_v8, %v110_v7 }
   0x4   :  { %v228_v6 = vpack.c.bf16 %v109_v5, %v108_v3  ;;  %v199_v10 = vld [vmem:[%s299_s2] ss:$0 sm:$0xff] }
   0x5   :  { %v202_v15 = vld [vmem:[%s300_s4] ss:$0 sm:$0xff] }
   0x6   :  { %229 = vmatpush3.bf16.msra.mxu1 %v228_v6 }
   0x7   :  { %230 = vmatprep.subr.bf16.mxu1 %v238_v4 }
   0xa   :  { %232 = vmatpush3.bf16.msra.mxu1 %v231_v9 }
  0xd6   :  { %v103_v11 = vpop.f32.mrb[0].mxu0 }
  0xd7   :  { %v104_v12 = vadd.f32 %v199_v10, %v103_v11  ;;  %v215_v13 = vpop.f32.mrb[1].mxu0 }
  0xd9   :  { %v107_v14 = vmax.f32 %v104_v12, 0.0 }
  0xdb   :  { %225 = vmatmul.mubr.msk.f32.vlgmr.msra.gmra.mrb[0].mxu1 %vm119_vm3, %v107_v14 }
 0x1ae   :  { %v189_v16 = vpop.f32.mrb[0].mxu1 }
 0x1af   :  { %v190_v17 = vadd.f32 %v202_v15, %v189_v16  ;;  %v226_v18 = vpop.f32.mrb[1].mxu1 }
 0x1b1   :  { %194 = vst.msk [vmem:[%s301_s5] sm:$0xff] %vm193_vm4, %v190_v17 }

</bundles_post_ra>
